<compile_context>
chip_gen: v7x
topology: tpu7x:2x2x1
jax: 0.10.0
libtpu: 0.0.40
codegen_flags: <defaults>
</compile_context>

<pallas_src>
import functools
import math

import jax
import jax.numpy as jnp
from jax.experimental import pallas as pl
from jax.experimental.pallas import tpu as pltpu


def _round_up(n, m):
    return ((n + m - 1) // m) * m


def _vmem_limit(need_bytes):
    """Scoped-VMEM limit: actual need + headroom, clamped to [32 MiB, 64 MiB]."""
    return int(min(max(need_bytes + (4 << 20), 32 << 20), 64 << 20))


# ----------------------------------------------------------------------------
# Kernel 1: tiled, pipelined matmul for the W_q / W_k / W_v (or fused QKV)
# projections.
# ----------------------------------------------------------------------------
def _matmul_kernel(x_ref, w_ref, o_ref, acc_ref):
    @pl.when(pl.program_id(2) == 0)
    def _():
        acc_ref[...] = jnp.zeros_like(acc_ref)

    acc_ref[...] += jnp.dot(
        x_ref[...], w_ref[...], preferred_element_type=jnp.float32
    )

    @pl.when(pl.program_id(2) == pl.num_programs(2) - 1)
    def _():
        o_ref[...] = acc_ref[...].astype(o_ref.dtype)


_TILE_CANDIDATES = (512, 256, 128)  # MXU-aligned; 256+ preferred on v6e/v7x.


def _pick_tile(dim):
    """Returns (tile, padded_dim).

    Prefers exact-dividing MXU-aligned tiles, uses a single full-extent block
    for small dims, otherwise zero-pads up to a tile multiple so a large
    non-divisible dim can never produce a whole-dimension (VMEM-busting) block.
    """
    for c in _TILE_CANDIDATES:
        if dim % c == 0:
            return c, dim
    if dim <= _TILE_CANDIDATES[0]:
        return dim, dim
    c = _TILE_CANDIDATES[0]
    return c, _round_up(dim, c)


def pallas_linear(x, w):
    """x: (M, K) @ w: (K, N) -> (M, N)  (nn.Linear with bias=False)."""
    M, K = x.shape
    K2, N = w.shape
    assert K == K2
    tm, Mp = _pick_tile(M)
    tn, Np = _pick_tile(N)
    tk, Kp = _pick_tile(K)
    xp = x if (Mp == M and Kp == K) else jnp.pad(x, ((0, Mp - M), (0, Kp - K)))
    wp = w if (Kp == K and Np == N) else jnp.pad(w, ((0, Kp - K), (0, Np - N)))

    itemsize = jnp.dtype(x.dtype).itemsize
    need = 2 * (tm * tk + tk * tn + tm * tn) * itemsize + tm * tn * 4

    out = pl.pallas_call(
        _matmul_kernel,
        out_shape=jax.ShapeDtypeStruct((Mp, Np), x.dtype),
        grid=(Mp // tm, Np // tn, Kp // tk),
        in_specs=[
            pl.BlockSpec((tm, tk), lambda i, j, k: (i, k)),
            pl.BlockSpec((tk, tn), lambda i, j, k: (k, j)),
        ],
        out_specs=pl.BlockSpec((tm, tn), lambda i, j, k: (i, j)),
        scratch_shapes=[pltpu.VMEM((tm, tn), jnp.float32)],
        compiler_params=pltpu.CompilerParams(
            dimension_semantics=("parallel", "parallel", "arbitrary"),
            vmem_limit_bytes=_vmem_limit(need),
        ),
    )(xp, wp)
    if Mp != M or Np != N:
        out = out[:M, :N]
    return out


# ----------------------------------------------------------------------------
# Kernel 2: multi-head masked scaled-dot-product attention with the W_o output
# projection fused into the epilogue.  Operands stay in (B, T, H) layout;
# valid_lens is a (B,) int32 vector prefetched into SMEM.
# ----------------------------------------------------------------------------
def _attend_heads(q, k, v, keep, *, num_heads, head_dim):
    """Per-head attention on (seq, H)-layout operands.

    q: (tq, H) (1/sqrt(d) already folded into W_q), k/v: (Tk, H),
    keep: (tq, Tk) bool key-validity mask.  Returns the head-concatenated
    context as one lane-dense (tq, H) float32 value.
    """
    # TODO(synk): for large num_heads move heads onto a grid axis (or a
    # lax.fori_loop) so the unrolled per-head (tq, Tk) temporaries do not
    # inflate vreg/VMEM live ranges; a static unroll is fine for small counts.
    outs = []
    for h in range(num_heads):
        sl = slice(h * head_dim, (h + 1) * head_dim)
        qh = q[:, sl]
        kh = k[:, sl]
        vh = v[:, sl]
        # QK^T by contracting head_dim of both operands (no k transpose).
        s = jax.lax.dot_general(
            qh, kh,
            dimension_numbers=(((1,), (1,)), ((), ())),
            preferred_element_type=jnp.float32,
        )
        # d2l masked_softmax semantics: invalid key positions get -1e6.
        s = jnp.where(keep, s, jnp.float32(-1000000.0))
        s = s - jnp.max(s, axis=-1, keepdims=True)
        p = jnp.exp(s)
        p = p / jnp.sum(p, axis=-1, keepdims=True)
        outs.append(
            jnp.dot(p.astype(vh.dtype), vh, preferred_element_type=jnp.float32)
        )
    return jnp.concatenate(outs, axis=-1)  # (tq, H) f32, lane dense


def _finalize(ctx, wo_ref, o_ref):
    """Fused W_o projection + a single full-width store of the output block."""
    wo = wo_ref[...]
    out = jnp.dot(ctx.astype(wo.dtype), wo, preferred_element_type=jnp.float32)
    o_ref[0] = out.astype(o_ref.dtype)


def _mha_fused_kernel(vl_ref, qkv_ref, wo_ref, o_ref, *, num_heads, head_dim,
                      num_hiddens):
    """Self-attention: one fused (1, T, 3H) qkv block per batch element."""
    vl = vl_ref[pl.program_id(0)]
    qkv = qkv_ref[0]                       # (T, 3H)
    H = num_hiddens
    q = qkv[:, 0 * H:1 * H]
    k = qkv[:, 1 * H:2 * H]
    v = qkv[:, 2 * H:3 * H]
    keep = jax.lax.broadcasted_iota(
        jnp.int32, (q.shape[0], k.shape[0]), 1) < vl
    ctx = _attend_heads(q, k, v, keep, num_heads=num_heads, head_dim=head_dim)
    _finalize(ctx, wo_ref, o_ref)


def _mha_kernel(vl_ref, q_ref, k_ref, v_ref, wo_ref, o_ref, *, num_heads,
                head_dim):
    """Cross-attention: separate q / k / v operands, q tiled along Tq."""
    vl = vl_ref[pl.program_id(0)]
    q = q_ref[0]                           # (tq, H)
    k = k_ref[0]                           # (Tk, H)
    v = v_ref[0]
    keep = jax.lax.broadcasted_iota(
        jnp.int32, (q.shape[0], k.shape[0]), 1) < vl
    ctx = _attend_heads(q, k, v, keep, num_heads=num_heads, head_dim=head_dim)
    _finalize(ctx, wo_ref, o_ref)


def _pick_seq_tile(T):
    if T <= 512:
        return T
    for c in (512, 256, 128):
        if T % c == 0:
            return c
    # TODO(synk): pad Tq for long, non-tile-divisible sequences.
    return T


def _mha_fused_call(vl, qkv, w_o, num_heads, head_dim, num_hiddens):
    B, T, threeH = qkv.shape
    H = num_hiddens
    kernel = functools.partial(_mha_fused_kernel, num_heads=num_heads,
                               head_dim=head_dim, num_hiddens=H)
    itemsize = jnp.dtype(qkv.dtype).itemsize
    need = 2 * (T * threeH + T * H) * itemsize + H * H * itemsize
    # TODO(synk): very long sequences need flash-style Tk tiling (online
    # softmax); here one batch element's k/v are assumed to fit in VMEM.
    grid_spec = pltpu.PrefetchScalarGridSpec(
        num_scalar_prefetch=1,
        grid=(B,),
        in_specs=[
            pl.BlockSpec((1, T, threeH), lambda b, vl_s: (b, 0, 0)),
            pl.BlockSpec((H, H), lambda b, vl_s: (0, 0)),
        ],
        out_specs=pl.BlockSpec((1, T, H), lambda b, vl_s: (b, 0, 0)),
    )
    return pl.pallas_call(
        kernel,
        out_shape=jax.ShapeDtypeStruct((B, T, H), qkv.dtype),
        grid_spec=grid_spec,
        compiler_params=pltpu.CompilerParams(
            dimension_semantics=("parallel",),
            vmem_limit_bytes=_vmem_limit(need),
        ),
    )(vl, qkv, w_o)


def _mha_call(vl, q, k, v, w_o, num_heads, head_dim):
    B, Tq, H = q.shape
    _, Tk, _ = k.shape
    tq = _pick_seq_tile(Tq)
    kernel = functools.partial(_mha_kernel, num_heads=num_heads,
                               head_dim=head_dim)
    itemsize = jnp.dtype(q.dtype).itemsize
    need = 2 * (2 * tq * H + 2 * Tk * H) * itemsize + H * H * itemsize
    grid_spec = pltpu.PrefetchScalarGridSpec(
        num_scalar_prefetch=1,
        grid=(B, Tq // tq),
        in_specs=[
            pl.BlockSpec((1, tq, H), lambda b, qi, vl_s: (b, qi, 0)),
            pl.BlockSpec((1, Tk, H), lambda b, qi, vl_s: (b, 0, 0)),
            pl.BlockSpec((1, Tk, H), lambda b, qi, vl_s: (b, 0, 0)),
            pl.BlockSpec((H, H), lambda b, qi, vl_s: (0, 0)),
        ],
        out_specs=pl.BlockSpec((1, tq, H), lambda b, qi, vl_s: (b, qi, 0)),
    )
    return pl.pallas_call(
        kernel,
        out_shape=jax.ShapeDtypeStruct((B, Tq, H), q.dtype),
        grid_spec=grid_spec,
        compiler_params=pltpu.CompilerParams(
            dimension_semantics=("parallel", "parallel"),
            vmem_limit_bytes=_vmem_limit(need),
        ),
    )(vl, q, k, v, w_o)


# ----------------------------------------------------------------------------
# MultiHeadAttention forward (bias=False, dropout treated as 0)
# ----------------------------------------------------------------------------
def multi_head_attention(queries, keys, values, valid_lens, params, num_heads,
                         compute_dtype=None):
    """params = (W_q, W_k, W_v, W_o), each stored as (in_features, out_features).

    Set compute_dtype=jnp.bfloat16 to feed the MXU in bf16 (f32 accumulation)
    at production shapes; the default keeps the input dtype.
    """
    W_q, W_k, W_v, W_o = params
    same_input = (queries is keys) and (keys is values)
    if compute_dtype is not None:
        queries, keys, values = (t.astype(compute_dtype)
                                 for t in (queries, keys, values))
        W_q, W_k, W_v, W_o = (w.astype(compute_dtype)
                              for w in (W_q, W_k, W_v, W_o))

    B, Tq, _ = queries.shape
    _, Tk, _ = keys.shape
    H = W_q.shape[1]
    head_dim = H // num_heads

    # Fold the 1/sqrt(d) attention scale into the query projection weight
    # (zero in-kernel cost).
    W_q = W_q * jnp.asarray(1.0 / math.sqrt(head_dim), W_q.dtype)

    if valid_lens is None:
        vl = jnp.full((B,), Tk, dtype=jnp.int32)
    else:
        # TODO(synk): d2l's masked_softmax also accepts 2-D (per-query)
        # valid_lens; only the 1-D per-sequence form is supported here.
        vl = valid_lens.astype(jnp.int32)

    if same_input and W_q.shape[0] == W_k.shape[0] == W_v.shape[0]:
        # Self-attention: one fused QKV matmul; its (B, T, 3H) output is
        # consumed directly by the attention kernel (no XLA slice copies).
        W_qkv = jnp.concatenate([W_q, W_k, W_v], axis=1)        # (in, 3H)
        qkv = pallas_linear(queries.reshape(B * Tq, -1), W_qkv)
        qkv = qkv.reshape(B, Tq, 3 * H)                         # free reshape
        return _mha_fused_call(vl, qkv, W_o, num_heads, head_dim, H)

    q = pallas_linear(queries.reshape(B * Tq, -1), W_q).reshape(B, Tq, H)
    k = pallas_linear(keys.reshape(B * Tk, -1), W_k).reshape(B, Tk, H)
    v = pallas_linear(values.reshape(B * Tk, -1), W_v).reshape(B, Tk, H)
    return _mha_call(vl, q, k, v, W_o, num_heads, head_dim)


# ----------------------------------------------------------------------------
# Pure-JAX reference (mirrors the PyTorch module) for correctness checks
# ----------------------------------------------------------------------------
def transpose_qkv(x, num_heads):
    B, T, H = x.shape
    x = x.reshape(B, T, num_heads, H // num_heads)
    x = jnp.transpose(x, (0, 2, 1, 3))
    return x.reshape(B * num_heads, T, H // num_heads)


def transpose_output(x, num_heads):
    BH, T, Dh = x.shape
    B = BH // num_heads
    x = x.reshape(B, num_heads, T, Dh)
    x = jnp.transpose(x, (0, 2, 1, 3))
    return x.reshape(B, T, num_heads * Dh)


def reference_mha(queries, keys, values, valid_lens, params, num_heads):
    W_q, W_k, W_v, W_o = params
    q = transpose_qkv(queries @ W_q, num_heads)
    k = transpose_qkv(keys @ W_k, num_heads)
    v = transpose_qkv(values @ W_v, num_heads)
    if valid_lens is None:
        vl = jnp.full((q.shape[0],), k.shape[1], dtype=jnp.int32)
    else:
        vl = jnp.repeat(valid_lens.astype(jnp.int32), num_heads)
    d = q.shape[-1]
    scores = jnp.einsum("bqd,bkd->bqk", q, k) / math.sqrt(d)
    col = jnp.arange(scores.shape[-1])[None, None, :]
    scores = jnp.where(col < vl[:, None, None], scores, -1000000.0)
    p = jax.nn.softmax(scores, axis=-1)
    out = jnp.einsum("bqk,bkd->bqd", p, v)
    return transpose_output(out, num_heads) @ W_o


if __name__ == "__main__":
    key = jax.random.PRNGKey(0)
    B, T, num_hiddens, num_heads = 2, 8, 32, 4

    ks = jax.random.split(key, 10)
    X = jax.random.normal(ks[0], (B, T, num_hiddens), dtype=jnp.float32)
    valid_lens = jnp.array([3, 6], dtype=jnp.int32)

    # Deterministic nn.Linear-like init; weights stored as (in, out).
    def init_w(k, fan_in, fan_out):
        bound = 1.0 / math.sqrt(fan_in)
        return jax.random.uniform(
            k, (fan_in, fan_out), dtype=jnp.float32, minval=-bound, maxval=bound
        )

    W_q = init_w(ks[1], num_hiddens, num_hiddens)
    W_k = init_w(ks[2], num_hiddens, num_hiddens)
    W_v = init_w(ks[3], num_hiddens, num_hiddens)
    W_o = init_w(ks[4], num_hiddens, num_hiddens)
    params = (W_q, W_k, W_v, W_o)

    # TPU's default matmul precision decomposes f32 operands into bf16 passes
    # (for both the Pallas kernels and the XLA reference), so the parity check
    # uses a bf16-class tolerance; genuine logic errors would be orders larger.
    TOL = dict(atol=2e-2, rtol=2e-2)

    # 1) Self-attention (fused QKV projection + fused W_o epilogue).
    out = jax.block_until_ready(
        multi_head_attention(X, X, X, valid_lens, params, num_heads))
    ref = reference_mha(X, X, X, valid_lens, params, num_heads)
    assert out.shape == (B, T, num_hiddens)
    err = float(jnp.max(jnp.abs(out - ref)))
    assert bool(jnp.allclose(out, ref, **TOL)), f"self-attn max|diff|={err}"

    # 2) Cross-attention with Tq != Tk (separate projections, Tq-tiled grid).
    Tq = 4
    Q_in = jax.random.normal(ks[5], (B, Tq, num_hiddens), dtype=jnp.float32)
    K_in = jax.random.normal(ks[6], (B, T, num_hiddens), dtype=jnp.float32)
    V_in = jax.random.normal(ks[7], (B, T, num_hiddens), dtype=jnp.float32)
    out2 = jax.block_until_ready(
        multi_head_attention(Q_in, K_in, V_in, valid_lens, params, num_heads))
    ref2 = reference_mha(Q_in, K_in, V_in, valid_lens, params, num_heads)
    assert out2.shape == (B, Tq, num_hiddens)
    err2 = float(jnp.max(jnp.abs(out2 - ref2)))
    assert bool(jnp.allclose(out2, ref2, **TOL)), f"cross-attn max|diff|={err2}"

    # 3) valid_lens=None path (unmasked softmax).
    out3 = jax.block_until_ready(
        multi_head_attention(X, X, X, None, params, num_heads))
    ref3 = reference_mha(X, X, X, None, params, num_heads)
    assert bool(jnp.allclose(out3, ref3, **TOL))

    print("KERNEL_OK")
</pallas_src>

<mosaic_0001>
module attributes {stable_mosaic.version = 11 : i64} {
  func.func @_matmul_kernel(%arg0: i32, %arg1: i32, %arg2: i32, %arg3: memref<16x32xf32, #tpu.memory_space<vmem>>, %arg4: memref<32x96xf32, #tpu.memory_space<vmem>>, %arg5: memref<16x96xf32, #tpu.memory_space<vmem>>, %arg6: memref<16x96xf32, #tpu.memory_space<vmem>>) attributes {dimension_semantics = [#tpu.dimension_semantics<parallel>, #tpu.dimension_semantics<parallel>, #tpu.dimension_semantics<arbitrary>], iteration_bounds = array<i64: 1, 1, 1>, scalar_prefetch = 0 : i64, scratch_operands = 1 : i64, tpu.core_type = #tpu.core_type<tc>, window_params = [{transform_indices = @transform_0, window_bounds = array<i64: 16, 32>}, {transform_indices = @transform_1, window_bounds = array<i64: 32, 96>}, {transform_indices = @transform_2, window_bounds = array<i64: 16, 96>}]} {
    %c0_i32 = arith.constant 0 : i32
    %0 = arith.cmpi eq, %arg2, %c0_i32 : i32
    %1 = arith.extui %0 : i1 to i32
    %c0_i32_0 = arith.constant 0 : i32
    %2 = arith.cmpi ne, %1, %c0_i32_0 : i32
    scf.if %2 {
      %cst_10 = arith.constant 0.000000e+00 : f32
      %12 = vector.broadcast %cst_10 : f32 to vector<16x96xf32>
      %c0_11 = arith.constant 0 : index
      %c0_12 = arith.constant 0 : index
      %13 = vector.load %arg6[%c0_11, %c0_12] : memref<16x96xf32, #tpu.memory_space<vmem>>, vector<16x96xf32>
      tpu.vector_store %arg6[%c0_11, %c0_12], %12 {strides = array<i32>} : memref<16x96xf32, #tpu.memory_space<vmem>>, vector<16x96xf32>,
    } else {
    }
    %c0 = arith.constant 0 : index
    %c0_1 = arith.constant 0 : index
    %3 = vector.load %arg6[%c0, %c0_1] : memref<16x96xf32, #tpu.memory_space<vmem>>, vector<16x96xf32>
    %c0_2 = arith.constant 0 : index
    %c0_3 = arith.constant 0 : index
    %4 = vector.load %arg3[%c0_2, %c0_3] : memref<16x32xf32, #tpu.memory_space<vmem>>, vector<16x32xf32>
    %c0_4 = arith.constant 0 : index
    %c0_5 = arith.constant 0 : index
    %5 = vector.load %arg4[%c0_4, %c0_5] : memref<32x96xf32, #tpu.memory_space<vmem>>, vector<32x96xf32>
    %cst = arith.constant dense<0.000000e+00> : vector<16x96xf32>
    %6 = tpu.matmul %4, %5, %cst {dimension_numbers = #tpu.dot_dimension_numbers<[1], [0], [0], [1], [0, 0, 1, 1], [], []>} : vector<16x32xf32>, vector<32x96xf32>, vector<16x96xf32> -> vector<16x96xf32>
    %7 = arith.addf %3, %6 : vector<16x96xf32>
    %c0_6 = arith.constant 0 : index
    %c0_7 = arith.constant 0 : index
    %8 = vector.load %arg6[%c0_6, %c0_7] : memref<16x96xf32, #tpu.memory_space<vmem>>, vector<16x96xf32>
    tpu.vector_store %arg6[%c0_6, %c0_7], %7 {strides = array<i32>} : memref<16x96xf32, #tpu.memory_space<vmem>>, vector<16x96xf32>,
    %c0_i32_8 = arith.constant 0 : i32
    %9 = arith.cmpi eq, %arg2, %c0_i32_8 : i32
    %10 = arith.extui %9 : i1 to i32
    %c0_i32_9 = arith.constant 0 : i32
    %11 = arith.cmpi ne, %10, %c0_i32_9 : i32
    scf.if %11 {
      %c0_10 = arith.constant 0 : index
      %c0_11 = arith.constant 0 : index
      %12 = vector.load %arg6[%c0_10, %c0_11] : memref<16x96xf32, #tpu.memory_space<vmem>>, vector<16x96xf32>
      %c0_12 = arith.constant 0 : index
      %c0_13 = arith.constant 0 : index
      %13 = vector.load %arg5[%c0_12, %c0_13] : memref<16x96xf32, #tpu.memory_space<vmem>>, vector<16x96xf32>
      tpu.vector_store %arg5[%c0_12, %c0_13], %12 {strides = array<i32>} : memref<16x96xf32, #tpu.memory_space<vmem>>, vector<16x96xf32>,
    } else {
    }
    return
  }
  func.func @transform_0(%arg0: i32, %arg1: i32, %arg2: i32) -> (i32, i32) {
    %c0_i32 = arith.constant 0 : i32
    return %arg0, %arg2 : i32, i32
  }
  func.func @transform_1(%arg0: i32, %arg1: i32, %arg2: i32) -> (i32, i32) {
    %c0_i32 = arith.constant 0 : i32
    return %arg2, %arg1 : i32, i32
  }
  func.func @transform_2(%arg0: i32, %arg1: i32, %arg2: i32) -> (i32, i32) {
    %c0_i32 = arith.constant 0 : i32
    return %arg0, %arg1 : i32, i32
  }
}

</mosaic_0001>

<bundles_post_ra>
// kernel: tpu_custom_call.1
= control target key start
LH: loop header
LB: loop body
LE: loop exit
PB: predicated region body
PF: predicated region fallthrough
CT: control target
= control target key end

     0   :  { %7 = vsyncpa [#allocation4], 0  ;;  %s344_s0 = inlined_call_operand.hbm [shape: f32[16,32], index: 0, kind: input, shape index: {}]   ;;  %s345_s1 = inlined_call_operand.hbm [shape: f32[32,96], index: 1, kind: input, shape index: {}]   ;;  %s346_s2 = inlined_call_operand.hbm [shape: f32[16,96], index: 2, kind: output, shape index: {}]  }
   0x1   :  { %8 = vsyncpa [#allocation7], 0 }
   0x2   :  { %9 = vsyncpa [#allocation5], 0  ;;  %s272_s9 = smov [#allocation3]   ;;  %s200_s13 = scalar_lea.hbm %s344_s0, 256 }
   0x3   :  { %s15_s10 = sshll.u32 %s272_s9, 4  ;;  %p201_p0 = scmp.ne.s32.totalorder %s344_s0, %s200_s13  ;;  %s16_s10 = int_to_ptr.vmem [resolvable:$true] %s15_s10 }
   0x4   :  { %p204_p1 = scmp.lt.u32.totalorder %s200_s13, %s344_s0 }
   0x6   :  { %p206_p2 = pnand %p204_p1, %p201_p0 }
   0x8   :  { %209 = shalt.err (!%p206_p2)
}
   0x9   :  { %s210_s18 = scalar_lea.vmem %s16_s10, 256  ;;  %p215_p4 = scmp.lt.s32.totalorder %s16_s10, %s16_s10 }
   0xa   :  { %p211_p3 = scmp.ne.s32.totalorder %s16_s10, %s210_s18  ;;  %p216_p5 = scmp.lt.s32.totalorder %s210_s18, %s210_s18 }
   0xc   :  { %p217_p6 = por %p216_p5, %p215_p4 }
   0xe   :  { %p218_p7 = pnand %p217_p6, %p211_p3 }
  0x10   :  { %221 = shalt.err (!%p218_p7)
}
  0x11   :  { %s273_s19 = smov 128   ;;  %s274_s20 = smov 8  }
  0x12   :  { %21 = dma.hbm_to_vmem [thread:$0]  %s344_s0, 256, %s16_s10, [#allocation4], %s273_s19, %s273_s19, %s274_s20  }
  0x13   :  { %s275_s23 = smov [#allocation6]   ;;  %s222_s27 = scalar_lea.hbm %s345_s1, 512 }
  0x14   :  { %s27_s24 = sshll.u32 %s275_s23, 4  ;;  %p223_p8 = scmp.ne.s32.totalorder %s345_s1, %s222_s27  ;;  %s28_s24 = int_to_ptr.vmem [resolvable:$true] %s27_s24 }
  0x15   :  { %p226_p9 = scmp.lt.u32.totalorder %s222_s27, %s345_s1 }
  0x17   :  { %p228_p10 = pnand %p226_p9, %p223_p8 }
  0x19   :  { %231 = shalt.err (!%p228_p10)
}
  0x1a   :  { %s232_s4 = scalar_lea.vmem %s28_s24, 512  ;;  %p237_p12 = scmp.lt.s32.totalorder %s28_s24, %s28_s24 }
  0x1b   :  { %p233_p11 = scmp.ne.s32.totalorder %s28_s24, %s232_s4  ;;  %p238_p13 = scmp.lt.s32.totalorder %s232_s4, %s232_s4 }
  0x1d   :  { %p239_p0 = por %p238_p13, %p237_p12 }
  0x1f   :  { %p240_p1 = pnand %p239_p0, %p233_p11 }
  0x21   :  { %243 = shalt.err (!%p240_p1)
}
  0x22   :  { %33 = dma.hbm_to_vmem [thread:$0]  %s345_s1, 512, %s28_s24, [#allocation7], %s273_s19, %s273_s19, %s274_s20  }
  0x23   :  { %266 = dma.done.wait [#allocation4], 256  }
  0x24   :  { %267 = vsyncadd [#allocation4], 4294967040 }
  0x25   :  { %268 = dma.done.wait [#allocation7], 512  }
  0x26   :  { %269 = vsyncadd [#allocation7], 4294966784  ;;  %vm44_vm0 = vcmask 785408   ;;  %v276_v0 = vmov 0.0   ;;  %vm55_vm1 = vcmask 261120   ;;  %v51_v1 = vld [vmem:[#allocation6] sm:$0xff] }
  0x27   :  { %46 = vst.msk [vmem:[#allocation2 + $0x8] sm:$0xff] %vm44_vm0, %v276_v0  ;;  %45 = vst.msk [vmem:[#allocation2] sm:$0xff] %vm44_vm0, %v276_v0  ;;  %v52_v2 = vld [vmem:[#allocation6 + $0x8] sm:$0xff]  ;;  %v53_v3 = vld [vmem:[#allocation6 + $0x10] sm:$0xff]  ;;  %s277_s1 = smov [#allocation8]  }
  0x28   :  { %v186_v4 = vpack.c.bf16 %v52_v2, %v51_v1  ;;  %v54_v5 = vld [vmem:[#allocation6 + $0x18] sm:$0xff]  ;;  %v49_v6 = vld [vmem:[#allocation3] sm:$0xff]  ;;  %s154_s6 = sshll.u32 %s277_s1, 4  ;;  %s155_s6 = int_to_ptr.vmem [resolvable:$true] %s154_s6 }
  0x29   :  { %v190_v7 = vpack.c.bf16 %v54_v5, %v53_v3  ;;  %183 = vmatprep.mubr.msk.f32.mxu0 %vm55_vm1, %v49_v6  ;;  %v50_v8 = vld [vmem:[#allocation3 + $0x8] sm:$0xff]  ;;  %s244_s7 = scalar_lea.vmem %s155_s6, 256  ;;  %p249_p3 = scmp.lt.s32.totalorder %s155_s6, %s155_s6 }
  0x2a   :  { %187 = vmatprep.subr.bf16.mxu0 %v186_v4  ;;  %p245_p2 = scmp.ne.s32.totalorder %s155_s6, %s244_s7  ;;  %p250_p4 = scmp.lt.s32.totalorder %s244_s7, %s244_s7 }
  0x2b   :  { %189 = vmatpush3.bf16.msra.mxu0 %v186_v4 }
  0x2c   :  { %191 = vmatprep.subr.bf16.mxu0 %v190_v7  ;;  %p251_p5 = por %p250_p4, %p249_p3 }
  0x2e   :  { %v48_v9 = vld [vmem:[#allocation2 + $0x8] sm:$0xff]  ;;  %v47_v10 = vld [vmem:[#allocation2] sm:$0xff]  ;;  %p252_p6 = pnand %p251_p5, %p245_p2 }
  0x2f   :  { %193 = vmatpush3.bf16.msra.mxu0 %v190_v7 }
  0x32   :  { %184 = vmatmul.mubr.msk.f32.vlgmr.msra.gmra.mrb[0].mxu0 %vm55_vm1, %v50_v8 }
 0x105   :  { %v185_v11 = vpop.f32.mrb[0].mxu0 }
 0x106   :  { %v138_v12 = vadd.f32 %v185_v11, %v48_v9  ;;  %v128_v13 = vpop.f32.mrb[1].mxu0 }
 0x107   :  { %v137_v14 = vadd.f32 %v128_v13, %v47_v10 }
 0x108   :  { %141 = vst.msk [vmem:[#allocation2 + $0x8] sm:$0xff] %vm44_vm0, %v138_v12 }
 0x109   :  { %140 = vst.msk [vmem:[#allocation2] sm:$0xff] %vm44_vm0, %v137_v14 }
 0x10f   :  { %v146_v15 = vld [vmem:[#allocation2 + $0x8] sm:$0xff] }
 0x110   :  { %v145_v16 = vld [vmem:[#allocation2] sm:$0xff]  ;;  %148 = vst.msk [vmem:[#allocation8 + $0x8] sm:$0xff] %vm44_vm0, %v146_v15 }
 0x111   :  { %147 = vst.msk [vmem:[#allocation8] sm:$0xff] %vm44_vm0, %v145_v16 }
 0x112   :  { %255 = shalt.err (!%p252_p6)
}
 0x113   :  { %s256_s10 = scalar_lea.hbm %s346_s2, 256 }
 0x114   :  { %p257_p7 = scmp.ne.s32.totalorder %s346_s2, %s256_s10  ;;  %p260_p8 = scmp.lt.u32.totalorder %s256_s10, %s346_s2 }
 0x116   :  { %p262_p9 = pnand %p260_p8, %p257_p7 }
 0x118   :  { %265 = shalt.err (!%p262_p9)
}
 0x119   :  { %160 = dma.vmem_to_hbm [thread:$0]  %s155_s6, 256, %s346_s2, [#allocation5], %s273_s19, %s273_s19, %s274_s20  }
 0x11a   :  { %270 = dma.done.wait [#allocation5], 256  }
 0x11b   :  { %271 = vsyncadd [#allocation5], 4294967040 }
 0x11c   :  { %164 = vsyncpa [#allocation4], 1 }
 0x11d   :  { %165 = vsyncpa [#allocation7], 1 }
 0x11e   :  { %166 = vsyncpa [#allocation5], 1 }

</bundles_post_ra>
